<compile_context>
chip_gen: v5e
topology: v5e:2x2
jax: 0.10.0
libtpu: 0.0.40
codegen_flags: <defaults>
</compile_context>

<pallas_src>
import functools

import jax
import jax.numpy as jnp
from jax.experimental import pallas as pl
from jax.experimental.pallas import tpu as pltpu


def _round_up(x: int, m: int) -> int:
    return ((x + m - 1) // m) * m


_ACTIVATIONS = {
    "relu": lambda y: jnp.maximum(y, 0.0),
    "gelu": jax.nn.gelu,
    "tanh": jnp.tanh,
}


def _fused_mlp_kernel(*refs, num_layers, activation, compute_dtype):
    """refs = (x, w0, b0, ..., w_{L-1}, b_{L-1}, out); one batch-row tile per grid step."""
    x_ref = refs[0]
    o_ref = refs[1 + 2 * num_layers]
    act = _ACTIVATIONS[activation]
    # bf16 cast happens here (VPU), not in the wrapper -> no extra HBM pass over x.
    h = x_ref[...].astype(compute_dtype)                 # (tm, dim_in)
    for li in range(num_layers):
        w_ref = refs[1 + 2 * li]
        b_ref = refs[2 + 2 * li]
        # MXU matmul, f32 accumulation; bias add + activation in f32 on the VPU.
        y = jnp.dot(h, w_ref[...], preferred_element_type=jnp.float32)
        y = y + b_ref[...]                               # (1, N) bias broadcasts over rows
        if 0 < li < num_layers - 1:
            y = act(y)                                   # activation on middle layers only
        # nn.Dropout(p=0.0), eval semantics -> identity.
        h = y if li == num_layers - 1 else y.astype(compute_dtype)
    o_ref[...] = h.astype(o_ref.dtype)


def mlp_forward(x, params, *, block_m=256, compute_dtype=jnp.bfloat16, activation="relu"):
    """Fused Pallas forward matching MLP.forward."""
    M, dim_in = x.shape
    num_layers = len(params)
    dim_out = params[-1][0].shape[1]

    # Lane-dense (multiple-of-128) OUTPUT feature dims for every layer; the input feature
    # dim stays unpadded (block dim == full array dim is legal). Zero padding is exact:
    # padded activation columns are exactly 0 and hit zero weight rows / zero bias.
    n_pads = [_round_up(w.shape[1], 128) for (w, _) in params]

    # Row tiling: multiple of 8; cap the tile so the grid has >= 2 steps whenever the
    # padded batch allows it (v7x megacore needs >= 2 "parallel" steps to use both TCs).
    m8 = _round_up(M, 8)
    if m8 <= 8:
        tm = m8
    else:
        tm = max(8, min(block_m, _round_up(m8 // 2, 8)))
    m_pad = _round_up(M, tm)

    # Only pad rows when strictly needed (no wrapper-side pad/cast pass in the common case).
    x_in = x if m_pad == M else jnp.pad(x, ((0, m_pad - M), (0, 0)))

    def _resident_spec(shape):
        # Constant index_map -> DMA'd once, stays resident. Single-buffered: the block
        # never changes, so the default double-buffer would be pure wasted VMEM.
        try:
            return pl.BlockSpec(shape, lambda i: (0,) * len(shape),
                                pipeline_mode=pl.Buffered(1))
        except Exception:  # older jax without pipeline_mode: fall back to default buffering
            return pl.BlockSpec(shape, lambda i: (0,) * len(shape))

    inputs = [x_in]
    in_specs = [pl.BlockSpec((tm, dim_in), lambda i: (i, 0))]
    k = dim_in
    for li, (w, b) in enumerate(params):
        n_pad = n_pads[li]
        w_p = jnp.pad(w, ((0, k - w.shape[0]), (0, n_pad - w.shape[1]))).astype(compute_dtype)
        b_p = jnp.pad(b, (0, n_pad - b.shape[0])).astype(jnp.float32).reshape(1, -1)
        inputs += [w_p, b_p]
        in_specs += [_resident_spec((k, n_pad)), _resident_spec((1, n_pad))]
        k = n_pad
    out_specs = pl.BlockSpec((tm, n_pads[-1]), lambda i: (i, 0))

    # Cost estimate for the surrounding XLA schedule.
    dims_c = [dim_in] + n_pads
    flops = 2 * m_pad * sum(dims_c[i] * dims_c[i + 1] for i in range(num_layers))
    param_bytes = sum(a.size * a.dtype.itemsize for a in inputs[1:])
    bytes_accessed = (x_in.size * x_in.dtype.itemsize
                      + param_bytes
                      + m_pad * n_pads[-1] * x.dtype.itemsize)

    # VMEM budget (per TensorCore -- on v7x each TC holds its own weight copy):
    #   double-buffered x/out tiles + single-buffered resident weights/biases
    #   + live f32 intermediates. Clamp to ~0.8x of the generation's VMEM capacity.
    vmem_est = (2 * tm * dim_in * x.dtype.itemsize
                + 2 * tm * n_pads[-1] * x.dtype.itemsize
                + param_bytes
                + 4 * tm * max(dims_c) * 4)
    try:
        vmem_cap = pltpu.get_tpu_info().vmem_capacity_bytes
    except Exception:
        vmem_cap = 64 << 20  # conservative per-TC fallback (v7x)
    vmem_limit = int(min(max(vmem_est, 32 << 20), int(0.8 * vmem_cap)))

    out_p = pl.pallas_call(
        functools.partial(_fused_mlp_kernel, num_layers=num_layers,
                          activation=activation, compute_dtype=compute_dtype),
        out_shape=jax.ShapeDtypeStruct((m_pad, n_pads[-1]), x.dtype),
        grid_spec=pl.GridSpec(
            grid=(m_pad // tm,),
            in_specs=in_specs,
            out_specs=out_specs,
        ),
        compiler_params=pltpu.CompilerParams(
            dimension_semantics=("parallel",),
            vmem_limit_bytes=vmem_limit,
        ),
        cost_estimate=pl.CostEstimate(
            flops=flops, transcendentals=0, bytes_accessed=bytes_accessed
        ),
    )(*inputs)

    # Skip the slice-copy entirely when no padding was applied (pure HBM-traffic saving).
    if m_pad == M and n_pads[-1] == dim_out:
        return out_p
    return out_p[:M, :dim_out]


def init_mlp_params(key, dim_in, dim_out, hidden_dim, num_layers, dtype=jnp.float32):
    """Deterministic init mirroring nn.Linear's U(-1/sqrt(fan_in), 1/sqrt(fan_in)).
    Returns list of (W [in, out], b [out]) for each Linear layer, in order."""
    dims = [dim_in] + [hidden_dim] * (num_layers - 1) + [dim_out]
    params = []
    for fan_in, fan_out in zip(dims[:-1], dims[1:]):
        key, kw, kb = jax.random.split(key, 3)
        bound = 1.0 / jnp.sqrt(jnp.asarray(fan_in, dtype))
        w = jax.random.uniform(kw, (fan_in, fan_out), dtype, -bound, bound)
        b = jax.random.uniform(kb, (fan_out,), dtype, -bound, bound)
        params.append((w, b))
    return params


def mlp_reference(x, params, *, compute_dtype=jnp.float32, activation="relu"):
    """Plain-JAX reference. compute_dtype=bf16 mirrors the kernel's operand casting."""
    act = _ACTIVATIONS[activation]
    n = len(params)
    h = x
    for i, (w, b) in enumerate(params):
        h = jnp.dot(h.astype(compute_dtype), w.astype(compute_dtype),
                    preferred_element_type=jnp.float32) + b.astype(jnp.float32)
        if 0 < i < n - 1:
            h = act(h)
    return h


if __name__ == "__main__":
    batch, dim_in, hidden_dim, dim_out, num_layers = 256, 32, 64, 16, 3

    key = jax.random.PRNGKey(0)
    key, kx = jax.random.split(key)
    x = jax.random.normal(kx, (batch, dim_in), jnp.float32)
    params = init_mlp_params(key, dim_in, dim_out, hidden_dim, num_layers)

    out = jax.block_until_ready(mlp_forward(x, params))
    assert out.shape == (batch, dim_out)

    # Tight check vs. a reference mirroring the kernel's bf16 operands / f32 accumulate.
    ref_bf16 = mlp_reference(x, params, compute_dtype=jnp.bfloat16)
    assert jnp.allclose(out, ref_bf16, atol=1e-3, rtol=1e-3)
    # Loose check vs. the pure-f32 PyTorch-equivalent forward (bf16 rounding budget).
    ref_f32 = mlp_reference(x, params, compute_dtype=jnp.float32)
    assert jnp.allclose(out, ref_f32, atol=5e-2, rtol=5e-2)

    # Ragged batch (not a multiple of 8/128) exercises the row-padding + slice path.
    out_ragged = jax.block_until_ready(mlp_forward(x[:5], params))
    assert out_ragged.shape == (5, dim_out)
    assert jnp.allclose(out_ragged, ref_bf16[:5], atol=1e-3, rtol=1e-3)

    print("KERNEL_OK")
</pallas_src>

<mosaic_0001>
module attributes {stable_mosaic.version = 11 : i64} {
  func.func @_fused_mlp_kernel(%arg0: i32, %arg1: memref<128x32xf32, #tpu.memory_space<vmem>>, %arg2: memref<32x128xbf16, #tpu.memory_space<vmem>>, %arg3: memref<1x128xf32, #tpu.memory_space<vmem>>, %arg4: memref<128x128xbf16, #tpu.memory_space<vmem>>, %arg5: memref<1x128xf32, #tpu.memory_space<vmem>>, %arg6: memref<128x128xbf16, #tpu.memory_space<vmem>>, %arg7: memref<1x128xf32, #tpu.memory_space<vmem>>, %arg8: memref<128x128xf32, #tpu.memory_space<vmem>>) attributes {dimension_semantics = [#tpu.dimension_semantics<parallel>], iteration_bounds = array<i64: 2>, scalar_prefetch = 0 : i64, scratch_operands = 0 : i64, tpu.core_type = #tpu.core_type<tc>, window_params = [{transform_indices = @transform_0, window_bounds = array<i64: 128, 32>}, {pipeline_mode = #tpu.pipeline_mode<synchronous>, transform_indices = @transform_1, window_bounds = array<i64: 32, 128>}, {pipeline_mode = #tpu.pipeline_mode<synchronous>, transform_indices = @transform_2, window_bounds = array<i64: 1, 128>}, {pipeline_mode = #tpu.pipeline_mode<synchronous>, transform_indices = @transform_3, window_bounds = array<i64: 128, 128>}, {pipeline_mode = #tpu.pipeline_mode<synchronous>, transform_indices = @transform_4, window_bounds = array<i64: 1, 128>}, {pipeline_mode = #tpu.pipeline_mode<synchronous>, transform_indices = @transform_5, window_bounds = array<i64: 128, 128>}, {pipeline_mode = #tpu.pipeline_mode<synchronous>, transform_indices = @transform_6, window_bounds = array<i64: 1, 128>}, {transform_indices = @transform_7, window_bounds = array<i64: 128, 128>}]} {
    %c0 = arith.constant 0 : index
    %c0_0 = arith.constant 0 : index
    %0 = vector.load %arg1[%c0, %c0_0] : memref<128x32xf32, #tpu.memory_space<vmem>>, vector<128x32xf32>
    %1 = arith.truncf %0 : vector<128x32xf32> to vector<128x32xbf16>
    %c0_1 = arith.constant 0 : index
    %c0_2 = arith.constant 0 : index
    %2 = vector.load %arg2[%c0_1, %c0_2] : memref<32x128xbf16, #tpu.memory_space<vmem>>, vector<32x128xbf16>
    %cst = arith.constant dense<0.000000e+00> : vector<128x128xf32>
    %3 = tpu.matmul %1, %2, %cst {dimension_numbers = #tpu.dot_dimension_numbers<[1], [0], [0], [1], [0, 0, 1, 1], [], []>} : vector<128x32xbf16>, vector<32x128xbf16>, vector<128x128xf32> -> vector<128x128xf32>
    %c0_3 = arith.constant 0 : index
    %c0_4 = arith.constant 0 : index
    %4 = vector.load %arg3[%c0_3, %c0_4] : memref<1x128xf32, #tpu.memory_space<vmem>>, vector<1x128xf32>
    %5 = vector.broadcast %4 : vector<1x128xf32> to vector<128x128xf32>
    %6 = arith.addf %3, %5 : vector<128x128xf32>
    %7 = arith.truncf %6 : vector<128x128xf32> to vector<128x128xbf16>
    %c0_5 = arith.constant 0 : index
    %c0_6 = arith.constant 0 : index
    %8 = vector.load %arg4[%c0_5, %c0_6] : memref<128x128xbf16, #tpu.memory_space<vmem>>, vector<128x128xbf16>
    %cst_7 = arith.constant dense<0.000000e+00> : vector<128x128xf32>
    %9 = tpu.matmul %7, %8, %cst_7 {dimension_numbers = #tpu.dot_dimension_numbers<[1], [0], [0], [1], [0, 0, 1, 1], [], []>} : vector<128x128xbf16>, vector<128x128xbf16>, vector<128x128xf32> -> vector<128x128xf32>
    %c0_8 = arith.constant 0 : index
    %c0_9 = arith.constant 0 : index
    %10 = vector.load %arg5[%c0_8, %c0_9] : memref<1x128xf32, #tpu.memory_space<vmem>>, vector<1x128xf32>
    %11 = vector.broadcast %10 : vector<1x128xf32> to vector<128x128xf32>
    %12 = arith.addf %9, %11 : vector<128x128xf32>
    %cst_10 = arith.constant 0.000000e+00 : f32
    %13 = vector.broadcast %cst_10 : f32 to vector<128x128xf32>
    %14 = arith.maximumf %12, %13 : vector<128x128xf32>
    %15 = arith.truncf %14 : vector<128x128xf32> to vector<128x128xbf16>
    %c0_11 = arith.constant 0 : index
    %c0_12 = arith.constant 0 : index
    %16 = vector.load %arg6[%c0_11, %c0_12] : memref<128x128xbf16, #tpu.memory_space<vmem>>, vector<128x128xbf16>
    %cst_13 = arith.constant dense<0.000000e+00> : vector<128x128xf32>
    %17 = tpu.matmul %15, %16, %cst_13 {dimension_numbers = #tpu.dot_dimension_numbers<[1], [0], [0], [1], [0, 0, 1, 1], [], []>} : vector<128x128xbf16>, vector<128x128xbf16>, vector<128x128xf32> -> vector<128x128xf32>
    %c0_14 = arith.constant 0 : index
    %c0_15 = arith.constant 0 : index
    %18 = vector.load %arg7[%c0_14, %c0_15] : memref<1x128xf32, #tpu.memory_space<vmem>>, vector<1x128xf32>
    %19 = vector.broadcast %18 : vector<1x128xf32> to vector<128x128xf32>
    %20 = arith.addf %17, %19 : vector<128x128xf32>
    %c0_16 = arith.constant 0 : index
    %c0_17 = arith.constant 0 : index
    %21 = vector.load %arg8[%c0_16, %c0_17] : memref<128x128xf32, #tpu.memory_space<vmem>>, vector<128x128xf32>
    tpu.vector_store %arg8[%c0_16, %c0_17], %20 {strides = array<i32>} : memref<128x128xf32, #tpu.memory_space<vmem>>, vector<128x128xf32>,
    return
  }
  func.func @transform_0(%arg0: i32) -> (i32, i32) {
    %c0_i32 = arith.constant 0 : i32
    %c0_i32_0 = arith.constant 0 : i32
    return %arg0, %c0_i32 : i32, i32
  }
  func.func @transform_1(%arg0: i32) -> (i32, i32) {
    %c0_i32 = arith.constant 0 : i32
    %c0_i32_0 = arith.constant 0 : i32
    %c0_i32_1 = arith.constant 0 : i32
    return %c0_i32, %c0_i32_0 : i32, i32
  }
  func.func @transform_2(%arg0: i32) -> (i32, i32) {
    %c0_i32 = arith.constant 0 : i32
    %c0_i32_0 = arith.constant 0 : i32
    %c0_i32_1 = arith.constant 0 : i32
    return %c0_i32, %c0_i32_0 : i32, i32
  }
  func.func @transform_3(%arg0: i32) -> (i32, i32) {
    %c0_i32 = arith.constant 0 : i32
    %c0_i32_0 = arith.constant 0 : i32
    %c0_i32_1 = arith.constant 0 : i32
    return %c0_i32, %c0_i32_0 : i32, i32
  }
  func.func @transform_4(%arg0: i32) -> (i32, i32) {
    %c0_i32 = arith.constant 0 : i32
    %c0_i32_0 = arith.constant 0 : i32
    %c0_i32_1 = arith.constant 0 : i32
    return %c0_i32, %c0_i32_0 : i32, i32
  }
  func.func @transform_5(%arg0: i32) -> (i32, i32) {
    %c0_i32 = arith.constant 0 : i32
    %c0_i32_0 = arith.constant 0 : i32
    %c0_i32_1 = arith.constant 0 : i32
    return %c0_i32, %c0_i32_0 : i32, i32
  }
  func.func @transform_6(%arg0: i32) -> (i32, i32) {
    %c0_i32 = arith.constant 0 : i32
    %c0_i32_0 = arith.constant 0 : i32
    %c0_i32_1 = arith.constant 0 : i32
    return %c0_i32, %c0_i32_0 : i32, i32
  }
  func.func @transform_7(%arg0: i32) -> (i32, i32) {
    %c0_i32 = arith.constant 0 : i32
    %c0_i32_0 = arith.constant 0 : i32
    return %arg0, %c0_i32 : i32, i32
  }
}

</mosaic_0001>

<bundles_post_ra>
// kernel: tpu_custom_call.1
= control target key start
LH: loop header
LB: loop body
LE: loop exit
PB: predicated region body
PF: predicated region fallthrough
CT: control target
= control target key end

     0   :  { %12 = vsyncpa [#allocation3], 0  ;;  %s1250_s0 = inlined_call_operand.vmem [shape: f32[256,32], index: 0, kind: input, shape index: {}]   ;;  %s1251_s1 = inlined_call_operand.vmem [shape: bf16[32,128], index: 1, kind: input, shape index: {}]   ;;  %s1252_s2 = inlined_call_operand.vmem [shape: f32[1,128], index: 2, kind: input, shape index: {}]   ;;  %s1253_s3 = inlined_call_operand.vmem [shape: bf16[128,128], index: 3, kind: input, shape index: {}]   ;;  %s1254_s4 = inlined_call_operand.vmem [shape: f32[1,128], index: 4, kind: input, shape index: {}]   ;;  %s1255_s5 = inlined_call_operand.vmem [shape: bf16[128,128], index: 5, kind: input, shape index: {}]   ;;  %s1256_s6 = inlined_call_operand.vmem [shape: f32[1,128], index: 6, kind: input, shape index: {}]   ;;  %s1257_s7 = inlined_call_operand.hbm [shape: f32[256,128], index: 7, kind: output, shape index: {}]  }
   0x1   :  { %14 = vsyncpa [#allocation3 + $0x1], 0  ;;  %s1036_s24 = smov 0   ;;  %s1038_s25 = smov 0  }
   0x2   :  { %s1040_s26 = smov 0   ;;  %s1042_s27 = smov 0  }
   0x3 LB: > { %s1057_s28 = sadd.s32 4294967295, %s992_s27   ;;  %s759_s29 = sadd.s32 4294967294, %s992_s27   ;;  %s992_s27 = sphi %s1042_s27, %s1263_s27   ;;  %s988_s26 = sphi %s1040_s26, %s1262_s26   ;;  %s984_s25 = sphi %s1038_s25, %s1261_s25   ;;  %s980_s24 = sphi %s1036_s24, %s1260_s24  }
   0x4   : > { %s1061_s30 = sadd.s32 1, %s992_s27   ;;  %s179_s8 = sadd.s32 1, %s988_s26 }
   0x5   : > { %s176_s9 = ssub.s32 %s992_s27, %s1061_s30  ;;  %p189_p0 = scmp.ne.s32.totalorder %s988_s26, %s984_s25 }
   0x6   : > { %p177_p1 = scmp.eq.s32.totalorder %s176_s9, 0  ;;  %p190_p2 = scmp.eq.s32.totalorder %s1057_s28, 1 }
   0x7   : > { %p195_p3 = scmp.ne.s32.totalorder %s984_s25, %s980_s24  ;;  %p196_p4 = scmp.eq.s32.totalorder %s759_s29, 1 }
   0x8   : > { %s1072_s10 = scalar_select %p177_p1, %s988_s26, %s179_s8  }
   0x9   : > { %p1074_p5 = por %p190_p2, %p189_p0  ;;  %p1078_p6 = por %p196_p4, %p195_p3 }
   0xa   : > { %p762_p7 = scmp.ge.s32.totalorder %s992_s27, 1  ;;  %p241_p8 = scmp.lt.s32.totalorder %s992_s27, 3 }
   0xc   : > { %p242_p9 = pnand %p762_p7, %p241_p8 }
   0xd   : > { %s764_s15 = sshll.u32 (!%p242_p9), %s1057_s28, 4  ;;  %s270_s16 = sand.u32 (!%p242_p9), 1, %s984_s25  }
   0xe   : > { %245 = sbr.rel (%p242_p9) target bundleno = 569 (0x239), region = 48  ;;  %p274_p10 = scmp.lt.s32.totalorder (!%p242_p9), %s764_s15, 31 }
   0xf   : > { %s763_s17 = sshll.u32 (!%p242_p9), %s270_s16, 7  ;;  %s869_s22 = sshll.u32 (!%p242_p9), %s1057_s28, 7 }
  0x10   : > { %s1198_s20 = scalar_lea.vmem (!%p242_p9), [#allocation2], %s763_s17  ;;  %s693_s8 = scalar_lea.hbm (!%p242_p9), %s1257_s7, %s869_s22 }
  0x11   : > { %s694_s9 = sshll.u32 (!%p242_p9), %s1198_s20, 4  ;;  %s682_s13 = scalar_lea.sflag (!%p242_p9), [#allocation3], %s270_s16  ;;  %s695_s9 = int_to_ptr.vmem [resolvable:$true] %s694_s9 }
  0x13   : > { %v852_v0 = vld [vmem:[%s1251_s1 + $0x8] sm:$0xff]  ;;  %v851_v1 = vld [vmem:[%s1251_s1] sm:$0xff]  ;;  %s1265_s15 = smov (!%p274_p10, %s764_s15), 31  ;;  %vm325_vm0 = vcmask 261120   ;;  %v860_v17 = vld [vmem:[%s1253_s3 + $0x38] sm:$0xff] }
  0x14   : > { %356 = vmatpush.bf16.msra.mxu0 %v852_v0  ;;  %s765_s18 = sshll.u32 %s1265_s15, 3  ;;  %475 = vmatpush.bf16.msra.mxu1 %v860_v17  ;;  %v859_v18 = vld [vmem:[%s1253_s3 + $0x30] sm:$0xff]  ;;  %v858_v22 = vld [vmem:[%s1253_s3 + $0x28] sm:$0xff]  ;;  %v857_v23 = vld [vmem:[%s1253_s3 + $0x20] sm:$0xff] }
  0x15   : > { %s1094_s21 = scalar_lea.vmem %s1250_s0, %s765_s18  ;;  %870 = vmatpush.bf16.msra.mxu3 %v860_v17  ;;  %v856_v24 = vld [vmem:[%s1253_s3 + $0x18] sm:$0xff]  ;;  %v855_v28 = vld [vmem:[%s1253_s3 + $0x10] sm:$0xff]  ;;  %v854_v29 = vld [vmem:[%s1253_s3 + $0x8] sm:$0xff]  ;;  %s950_s18 = scalar_lea.hbm %s1257_s7, 256 }
  0x16   : > { %v281_v2 = vld [vmem:[%s1094_s21] sm:$0xff]  ;;  %v282_v3 = vld [vmem:[%s1094_s21 + $0x8] sm:$0xff]  ;;  %v283_v5 = vld [vmem:[%s1094_s21 + $0x10] sm:$0xff] }
  0x17   : > { %v297_v4 = vpack.c.bf16 %v282_v3, %v281_v2  ;;  %v284_v6 = vld [vmem:[%s1094_s21 + $0x18] sm:$0xff]  ;;  %v285_v8 = vld [vmem:[%s1094_s21 + $0x20] sm:$0xff]  ;;  %v286_v9 = vld [vmem:[%s1094_s21 + $0x28] sm:$0xff] }
  0x18   : > { %357 = vmatpush.bf16.msra.mxu0 %v851_v1  ;;  %v298_v7 = vpack.c.bf16 %v284_v6, %v283_v5  ;;  %v299_v10 = vpack.c.bf16 %v286_v9, %v285_v8  ;;  %v287_v11 = vld [vmem:[%s1094_s21 + $0x30] sm:$0xff]  ;;  %v288_v12 = vld [vmem:[%s1094_s21 + $0x38] sm:$0xff]  ;;  %v289_v14 = vld [vmem:[%s1094_s21 + $0x40] sm:$0xff]  ;;  %476 = vmatpush.bf16.msra.mxu1 %v859_v18 }
  0x19   : > { %v300_v13 = vpack.c.bf16 %v288_v12, %v287_v11  ;;  %v290_v15 = vld [vmem:[%s1094_s21 + $0x48] sm:$0xff]  ;;  %871 = vmatpush.bf16.msra.mxu3 %v859_v18  ;;  %v291_v19 = vld [vmem:[%s1094_s21 + $0x50] sm:$0xff]  ;;  %v292_v20 = vld [vmem:[%s1094_s21 + $0x58] sm:$0xff] }
  0x1a   : > { %v301_v16 = vpack.c.bf16 %v290_v15, %v289_v14  ;;  %v302_v21 = vpack.c.bf16 %v292_v20, %v291_v19  ;;  %v293_v25 = vld [vmem:[%s1094_s21 + $0x60] sm:$0xff]  ;;  %v294_v26 = vld [vmem:[%s1094_s21 + $0x68] sm:$0xff]  ;;  %v295_v31 = vld [vmem:[%s1094_s21 + $0x70] sm:$0xff] }
  0x1b   : > { %774 = vmatmul.msk.bf16.vlgmr.msra.gmra.mxu0 %vm325_vm0, %v297_v4  ;;  %v303_v27 = vpack.c.bf16 %v294_v26, %v293_v25  ;;  %v853_v30 = vld [vmem:[%s1253_s3] sm:$0xff]  ;;  %v296_v32 = vld [vmem:[%s1094_s21 + $0x78] sm:$0xff]  ;;  %v867_v2 = vld [vmem:[%s1255_s5 + $0x30] sm:$0xff]  ;;  %s696_s21 = sshll.u32 %s693_s8, 4  ;;  %s697_s21 = int_to_ptr.hbm [resolvable:$true] %s696_s21 }
  0x1c   : > { %477 = vmatpush.bf16.msra.mxu1 %v858_v22  ;;  %v304_v33 = vpack.c.bf16 %v296_v32, %v295_v31  ;;  %v1147_v35 = vld [vmem:[%s1252_s2] ss:$0 sm:$0xff]  ;;  %v868_v62 = vld [vmem:[%s1255_s5 + $0x38] sm:$0xff]  ;;  %v866_v3 = vld [vmem:[%s1255_s5 + $0x28] sm:$0xff]  ;;  %s944_s14 = sshra.s32 %s697_s21, 4  ;;  %s945_s14 = int_to_ptr.hbm [resolvable:$true] %s944_s14 }
  0x1d   : > { %872 = vmatpush.bf16.msra.mxu3 %v858_v22  ;;  %616 = vmatpush.bf16.msra.mxu2 %v868_v62  ;;  %v865_v5 = vld [vmem:[%s1255_s5 + $0x20] sm:$0xff]  ;;  %v863_v11 = vld [vmem:[%s1255_s5 + $0x10] sm:$0xff]  ;;  %s946_s28 = scalar_lea.hbm %s945_s14, 128  ;;  %p951_p0 = scmp.lt.s32.totalorder %s945_s14, %s1257_s7 }
  0x1e   : > { %v861_v14 = vld [vmem:[%s1255_s5] sm:$0xff]  ;;  %p947_p11 = scmp.ne.s32.totalorder %s945_s14, %s946_s28  ;;  %p952_p1 = scmp.lt.s32.totalorder %s950_s18, %s946_s28 }
  0x1f   : > { %v928_v20 = vld [vmem:[%s1254_s4] ss:$0 sm:$0xff] }
  0x20   : > { %478 = vmatpush.bf16.msra.mxu1 %v857_v23  ;;  %p948_p12 = pnand %p947_p11, %p1074_p5  ;;  %p953_p2 = por %p952_p1, %p951_p0 }
  0x21   : > { %873 = vmatpush.bf16.msra.mxu3 %v857_v23  ;;  %617 = vmatpush.bf16.msra.mxu2 %v867_v2 }
  0x22   : > { %p949_p13 = pneg %p948_p12 }
  0x24   : > { %479 = vmatpush.bf16.msra.mxu1 %v856_v24  ;;  %p954_p3 = pnand %p953_p2, %p949_p13 }
  0x25   : > { %874 = vmatpush.bf16.msra.mxu3 %v856_v24  ;;  %618 = vmatpush.bf16.msra.mxu2 %v866_v3 }
  0x28   : > { %480 = vmatpush.bf16.msra.mxu1 %v855_v28 }
  0x29   : > { %875 = vmatpush.bf16.msra.mxu3 %v855_v28  ;;  %619 = vmatpush.bf16.msra.mxu2 %v865_v5 }
  0x2b   : > { %775 = vmatmul.msk.bf16.gmra.mxu0 %vm325_vm0, %v298_v7  ;;  %v864_v7 = vld [vmem:[%s1255_s5 + $0x18] sm:$0xff] }
  0x2c   : > { %481 = vmatpush.bf16.msra.mxu1 %v854_v29 }
  0x2d   : > { %876 = vmatpush.bf16.msra.mxu3 %v854_v29  ;;  %620 = vmatpush.bf16.msra.mxu2 %v864_v7 }
  0x30   : > { %482 = vmatpush.bf16.msra.mxu1 %v853_v30 }
  0x31   : > { %877 = vmatpush.bf16.msra.mxu3 %v853_v30  ;;  %621 = vmatpush.bf16.msra.mxu2 %v863_v11 }
  0x35   : > { %878 = vmatpush.bf16.msrb.mxu3 %v868_v62 }
  0x39   : > { %879 = vmatpush.bf16.msrb.mxu3 %v867_v2 }
  0x3b   : > { %776 = vmatmul.msk.bf16.gmra.mxu0 %vm325_vm0, %v299_v10 }
  0x3d   : > { %880 = vmatpush.bf16.msrb.mxu3 %v866_v3 }
  0x41   : > { %881 = vmatpush.bf16.msrb.mxu3 %v865_v5 }
  0x45   : > { %882 = vmatpush.bf16.msrb.mxu3 %v864_v7 }
  0x49   : > { %883 = vmatpush.bf16.msrb.mxu3 %v863_v11 }
  0x4b   : > { %777 = vmatmul.msk.bf16.gmra.mxu0 %vm325_vm0, %v300_v13  ;;  %v862_v13 = vld [vmem:[%s1255_s5 + $0x8] sm:$0xff] }
  0x4c   : > { %622 = vmatpush.bf16.msra.mxu2 %v862_v13 }
  0x4d   : > { %884 = vmatpush.bf16.msrb.mxu3 %v862_v13 }
  0x50   : > { %623 = vmatpush.bf16.msra.mxu2 %v861_v14 }
  0x51   : > { %885 = vmatpush.bf16.msrb.mxu3 %v861_v14 }
  0x5b   : > { %778 = vmatmul.msk.bf16.gmra.mxu0 %vm325_vm0, %v301_v16 }
  0x6b   : > { %779 = vmatmul.msk.bf16.gmra.mxu0 %vm325_vm0, %v302_v21 }
  0x7b   : > { %780 = vmatmul.msk.bf16.gmra.mxu0 %vm325_vm0, %v303_v27 }
  0x8b   : > { %781 = vmatmul.msk.bf16.gmra.mxu0 %vm325_vm0, %v304_v33 }
  0x98   : > { %v359_v34 = vpop.f32.mrf.mxu0 }
  0x99   : > { %v360_v37 = vadd.f32 %v1147_v35, %v359_v34 }
  0xa0   : > { %v361_v36 = vpop.f32.mrf.mxu0 }
  0xa1   : > { %v362_v38 = vadd.f32 %v1147_v35, %v361_v36 }
  0xa3   : > { %v399_v39 = vpack.c.bf16 %v362_v38, %v360_v37 }
  0xa5   : > { %483 = vmatmul.bf16.vlgmr.msra.gmra.mxu1 %v399_v39 }
  0xa8   : > { %v364_v40 = vpop.f32.mrf.mxu0 }
  0xa9   : > { %v365_v42 = vadd.f32 %v1147_v35, %v364_v40 }
  0xb0   : > { %v366_v41 = vpop.f32.mrf.mxu0 }
  0xb1   : > { %v367_v43 = vadd.f32 %v1147_v35, %v366_v41 }
  0xb3   : > { %v400_v44 = vpack.c.bf16 %v367_v43, %v365_v42 }
  0xb5   : > { %488 = vmatmul.bf16.gmra.mxu1 %v400_v44 }
  0xb8   : > { %v369_v45 = vpop.f32.mrf.mxu0 }
  0xb9   : > { %v370_v47 = vadd.f32 %v1147_v35, %v369_v45 }
  0xc0   : > { %v371_v46 = vpop.f32.mrf.mxu0 }
  0xc1   : > { %v372_v48 = vadd.f32 %v1147_v35, %v371_v46 }
  0xc3   : > { %v401_v49 = vpack.c.bf16 %v372_v48, %v370_v47 }
  0xc5   : > { %493 = vmatmul.bf16.gmra.mxu1 %v401_v49 }
  0xc8   : > { %v374_v50 = vpop.f32.mrf.mxu0 }
  0xc9   : > { %v375_v52 = vadd.f32 %v1147_v35, %v374_v50 }
  0xd0   : > { %v376_v51 = vpop.f32.mrf.mxu0 }
  0xd1   : > { %v377_v53 = vadd.f32 %v1147_v35, %v376_v51 }
  0xd3   : > { %v402_v54 = vpack.c.bf16 %v377_v53, %v375_v52 }
  0xd5   : > { %498 = vmatmul.bf16.gmra.mxu1 %v402_v54 }
  0xd8   : > { %v379_v55 = vpop.f32.mrf.mxu0 }
  0xd9   : > { %v380_v57 = vadd.f32 %v1147_v35, %v379_v55 }
  0xe0   : > { %v381_v56 = vpop.f32.mrf.mxu0 }
  0xe1   : > { %v382_v58 = vadd.f32 %v1147_v35, %v381_v56 }
  0xe3   : > { %v403_v59 = vpack.c.bf16 %v382_v58, %v380_v57 }
  0xe5   : > { %503 = vmatmul.bf16.gmra.mxu1 %v403_v59 }
  0xe8   : > { %v384_v60 = vpop.f32.mrf.mxu0 }
  0xe9   : > { %v385_v63 = vadd.f32 %v1147_v35, %v384_v60 }
  0xf0   : > { %v386_v61 = vpop.f32.mrf.mxu0 }
  0xf1   : > { %v387_v0 = vadd.f32 %v1147_v35, %v386_v61 }
  0xf3   : > { %v404_v1 = vpack.c.bf16 %v387_v0, %v385_v63 }
  0xf5   : > { %508 = vmatmul.bf16.gmra.mxu1 %v404_v1 }
  0xf8   : > { %v389_v4 = vpop.f32.mrf.mxu0 }
  0xf9   : > { %v390_v8 = vadd.f32 %v1147_v35, %v389_v4 }
 0x100   : > { %v391_v6 = vpop.f32.mrf.mxu0 }
 0x101   : > { %v392_v9 = vadd.f32 %v1147_v35, %v391_v6 }
 0x103   : > { %v405_v10 = vpack.c.bf16 %v392_v9, %v390_v8 }
 0x105   : > { %513 = vmatmul.bf16.vlgmr.msra.gmra.mxu3 %v405_v10 }
 0x108   : > { %v394_v12 = vpop.f32.mrf.mxu0 }
 0x109   : > { %v395_v16 = vadd.f32 %v1147_v35, %v394_v12  ;;  %v929_v12 = vld [vmem:[%s1256_s6] ss:$0 sm:$0xff] }
 0x110   : > { %v396_v15 = vpop.f32.mrf.mxu0 }
 0x111   : > { %v397_v17 = vadd.f32 %v1147_v35, %v396_v15 }
 0x113   : > { %v406_v18 = vpack.c.bf16 %v397_v17, %v395_v16 }
 0x115   : > { %518 = vmatmul.bf16.gmra.mxu3 %v406_v18 }
 0x122   : > { %v484_v19 = vpop.f32.mrf.mxu1 }
 0x123   : > { %v485_v21 = vadd.f32 %v928_v20, %v484_v19 }
 0x125   : > { %v524_v24 = vmax.f32 %v485_v21, 0.0 }
 0x12a   : > { %v486_v22 = vpop.f32.mrf.mxu1 }
 0x12b   : > { %v487_v23 = vadd.f32 %v928_v20, %v486_v22 }
 0x12d   : > { %v525_v25 = vmax.f32 %v487_v23, 0.0 }
 0x12f   : > { %v540_v26 = vpack.c.bf16 %v525_v25, %v524_v24 }
 0x131   : > { %624 = vmatmul.bf16.vlgmr.msra.gmra.mxu2 %v540_v26 }
 0x132   : > { %v489_v27 = vpop.f32.mrf.mxu1 }
 0x133   : > { %v490_v28 = vadd.f32 %v928_v20, %v489_v27 }
 0x135   : > { %v526_v31 = vmax.f32 %v490_v28, 0.0 }
 0x13a   : > { %v491_v29 = vpop.f32.mrf.mxu1 }
 0x13b   : > { %v492_v30 = vadd.f32 %v928_v20, %v491_v29 }
 0x13d   : > { %v527_v32 = vmax.f32 %v492_v30, 0.0 }
 0x13f   : > { %v541_v33 = vpack.c.bf16 %v527_v32, %v526_v31 }
 0x141   : > { %629 = vmatmul.bf16.gmra.mxu2 %v541_v33 }
 0x142   : > { %v494_v34 = vpop.f32.mrf.mxu1 }
 0x143   : > { %v495_v35 = vadd.f32 %v928_v20, %v494_v34 }
 0x145   : > { %v528_v38 = vmax.f32 %v495_v35, 0.0 }
 0x14a   : > { %v496_v36 = vpop.f32.mrf.mxu1 }
 0x14b   : > { %v497_v37 = vadd.f32 %v928_v20, %v496_v36 }
 0x14d   : > { %v529_v39 = vmax.f32 %v497_v37, 0.0 }
 0x14f   : > { %v542_v40 = vpack.c.bf16 %v529_v39, %v528_v38 }
 0x151   : > { %634 = vmatmul.bf16.gmra.mxu2 %v542_v40 }
 0x152   : > { %v499_v41 = vpop.f32.mrf.mxu1 }
 0x153   : > { %v500_v42 = vadd.f32 %v928_v20, %v499_v41 }
 0x155   : > { %v530_v45 = vmax.f32 %v500_v42, 0.0 }
 0x15a   : > { %v501_v43 = vpop.f32.mrf.mxu1 }
 0x15b   : > { %v502_v44 = vadd.f32 %v928_v20, %v501_v43 }
 0x15d   : > { %v531_v46 = vmax.f32 %v502_v44, 0.0 }
 0x15f   : > { %v543_v47 = vpack.c.bf16 %v531_v46, %v530_v45 }
 0x161   : > { %639 = vmatmul.bf16.gmra.mxu2 %v543_v47 }
 0x162   : > { %v504_v48 = vpop.f32.mrf.mxu1 }
 0x163   : > { %v505_v49 = vadd.f32 %v928_v20, %v504_v48 }
 0x165   : > { %v532_v52 = vmax.f32 %v505_v49, 0.0 }
 0x16a   : > { %v506_v50 = vpop.f32.mrf.mxu1 }
 0x16b   : > { %v507_v51 = vadd.f32 %v928_v20, %v506_v50 }
 0x16d   : > { %v533_v53 = vmax.f32 %v507_v51, 0.0 }
 0x16f   : > { %v544_v54 = vpack.c.bf16 %v533_v53, %v532_v52 }
 0x171   : > { %644 = vmatmul.bf16.gmra.mxu2 %v544_v54 }
 0x172   : > { %v509_v55 = vpop.f32.mrf.mxu1 }
 0x173   : > { %v510_v56 = vadd.f32 %v928_v20, %v509_v55 }
 0x175   : > { %v534_v59 = vmax.f32 %v510_v56, 0.0 }
 0x17a   : > { %v511_v57 = vpop.f32.mrf.mxu1 }
 0x17b   : > { %v512_v58 = vadd.f32 %v928_v20, %v511_v57 }
 0x17d   : > { %v535_v60 = vmax.f32 %v512_v58, 0.0 }
 0x17f   : > { %v545_v61 = vpack.c.bf16 %v535_v60, %v534_v59 }
 0x181   : > { %649 = vmatmul.bf16.gmra.mxu2 %v545_v61 }
 0x188   : > { %v514_v62 = vpop.f32.mrf.mxu3 }
 0x189   : > { %v515_v63 = vadd.f32 %v928_v20, %v514_v62 }
 0x18b   : > { %v536_v2 = vmax.f32 %v515_v63, 0.0 }
 0x190   : > { %v516_v0 = vpop.f32.mrf.mxu3 }
 0x191   : > { %v517_v1 = vadd.f32 %v928_v20, %v516_v0 }
 0x193   : > { %v537_v3 = vmax.f32 %v517_v1, 0.0 }
 0x195   : > { %v546_v4 = vpack.c.bf16 %v537_v3, %v536_v2 }
 0x197   : > { %654 = vmatmul.bf16.vlgmr.msrb.gmra.mxu3 %v546_v4 }
 0x198   : > { %v519_v5 = vpop.f32.mrf.mxu3 }
 0x199   : > { %v520_v6 = vadd.f32 %v928_v20, %v519_v5 }
 0x19b   : > { %v538_v9 = vmax.f32 %v520_v6, 0.0 }
 0x1a0   : > { %v521_v7 = vpop.f32.mrf.mxu3 }
 0x1a1   : > { %v522_v8 = vadd.f32 %v928_v20, %v521_v7 }
 0x1a3   : > { %v539_v10 = vmax.f32 %v522_v8, 0.0 }
 0x1a5   : > { %v547_v11 = vpack.c.bf16 %v539_v10, %v538_v9 }
 0x1a7   : > { %659 = vmatmul.bf16.gmra.mxu3 %v547_v11 }
 0x1b4   : > { %v625_v13 = vpop.f32.mrf.mxu2 }
 0x1b5   : > { %v626_v14 = vadd.f32 %v929_v12, %v625_v13 }
 0x1b7   : > { %665 = vst [vmem:[%s1198_s20] sm:$0xff] %v626_v14 }
 0x1bc   : > { %v627_v15 = vpop.f32.mrf.mxu2 }
 0x1bd   : > { %v628_v16 = vadd.f32 %v929_v12, %v627_v15 }
 0x1bf   : > { %666 = vst [vmem:[%s1198_s20 + $0x8] sm:$0xff] %v628_v16 }
 0x1c4   : > { %v630_v17 = vpop.f32.mrf.mxu2 }
 0x1c5   : > { %v631_v18 = vadd.f32 %v929_v12, %v630_v17 }
 0x1c7   : > { %667 = vst [vmem:[%s1198_s20 + $0x10] sm:$0xff] %v631_v18 }
 0x1cc   : > { %v632_v19 = vpop.f32.mrf.mxu2 }
 0x1cd   : > { %v633_v20 = vadd.f32 %v929_v12, %v632_v19 }
 0x1cf   : > { %668 = vst [vmem:[%s1198_s20 + $0x18] sm:$0xff] %v633_v20 }
 0x1d4   : > { %v635_v21 = vpop.f32.mrf.mxu2 }
 0x1d5   : > { %v636_v22 = vadd.f32 %v929_v12, %v635_v21 }
 0x1d7   : > { %669 = vst [vmem:[%s1198_s20 + $0x20] sm:$0xff] %v636_v22 }
 0x1dc   : > { %v637_v23 = vpop.f32.mrf.mxu2 }
 0x1dd   : > { %v638_v24 = vadd.f32 %v929_v12, %v637_v23 }
 0x1df   : > { %670 = vst [vmem:[%s1198_s20 + $0x28] sm:$0xff] %v638_v24 }
 0x1e4   : > { %v640_v25 = vpop.f32.mrf.mxu2 }
 0x1e5   : > { %v641_v26 = vadd.f32 %v929_v12, %v640_v25 }
 0x1e7   : > { %671 = vst [vmem:[%s1198_s20 + $0x30] sm:$0xff] %v641_v26 }
 0x1ec   : > { %v642_v27 = vpop.f32.mrf.mxu2 }
 0x1ed   : > { %v643_v28 = vadd.f32 %v929_v12, %v642_v27 }
 0x1ef   : > { %672 = vst [vmem:[%s1198_s20 + $0x38] sm:$0xff] %v643_v28 }
 0x1f4   : > { %v645_v29 = vpop.f32.mrf.mxu2 }
 0x1f5   : > { %v646_v30 = vadd.f32 %v929_v12, %v645_v29 }
 0x1f7   : > { %673 = vst [vmem:[%s1198_s20 + $0x40] sm:$0xff] %v646_v30 }
 0x1fc   : > { %v647_v31 = vpop.f32.mrf.mxu2 }
 0x1fd   : > { %v648_v32 = vadd.f32 %v929_v12, %v647_v31 }
 0x1ff   : > { %674 = vst [vmem:[%s1198_s20 + $0x48] sm:$0xff] %v648_v32 }
 0x204   : > { %v650_v33 = vpop.f32.mrf.mxu2 }
 0x205   : > { %v651_v34 = vadd.f32 %v929_v12, %v650_v33 }
 0x207   : > { %675 = vst [vmem:[%s1198_s20 + $0x50] sm:$0xff] %v651_v34 }
 0x20c   : > { %v652_v35 = vpop.f32.mrf.mxu2 }
 0x20d   : > { %v653_v36 = vadd.f32 %v929_v12, %v652_v35 }
 0x20f   : > { %676 = vst [vmem:[%s1198_s20 + $0x58] sm:$0xff] %v653_v36 }
 0x21a   : > { %v655_v37 = vpop.f32.mrf.mxu3 }
 0x21b   : > { %v656_v38 = vadd.f32 %v929_v12, %v655_v37 }
 0x21d   : > { %677 = vst [vmem:[%s1198_s20 + $0x60] sm:$0xff] %v656_v38 }
 0x222   : > { %v657_v39 = vpop.f32.mrf.mxu3 }
 0x223   : > { %v658_v40 = vadd.f32 %v929_v12, %v657_v39 }
 0x225   : > { %678 = vst [vmem:[%s1198_s20 + $0x68] sm:$0xff] %v658_v40 }
 0x22a   : > { %v660_v41 = vpop.f32.mrf.mxu3 }
 0x22b   : > { %v661_v42 = vadd.f32 %v929_v12, %v660_v41 }
 0x22d   : > { %679 = vst [vmem:[%s1198_s20 + $0x70] sm:$0xff] %v661_v42 }
 0x232   : > { %v662_v43 = vpop.f32.mrf.mxu3 }
 0x233   : > { %v663_v44 = vadd.f32 %v929_v12, %v662_v43 }
 0x235   : > { %680 = vst [vmem:[%s1198_s20 + $0x78] sm:$0xff] %v663_v44 }
 0x236   : > { %957 = shalt.err (!%p954_p3)
}
 0x237   : > { %s994_s16 = smov 128   ;;  %s995_s20 = smov 8  }
 0x238   : > { %886 = dma.vmem_to_hbm [thread:$0]  (%p1074_p5), %s695_s9, 2048, %s697_s21, %s682_s13, %s994_s16, %s994_s16, %s995_s20  }
 0x239 PF: > { %p892_p4 = scmp.ge.s32.totalorder %s992_s27, 2  ;;  %s711_s23 = sand.u32 1, %s980_s24  }
 0x23a   : > { %s712_s29 = scalar_lea.sflag [#allocation3], %s711_s23 }
 0x23b   : > { %p889_p7 = pnand %p892_p4, %p1078_p6 }
 0x23d   : > { %p890_p8 = pneg %p889_p7 }
 0x23f   : > { %975 = dma.done.wait (%p890_p8), %s712_s29, 2048  }
 0x240   : > { %977 = vsyncadd (%p890_p8), %s712_s29, 4294965248  ;;  %p17_p9 = scmp.ge.s32.totalorder %s1061_s30, 4   ;;  %s1260_s24 = smov %s984_s25 }
 0x241   : > { %s1261_s25 = smov %s988_s26  ;;  %s1262_s26 = smov %s1072_s10 }
 0x242   : > { %s1263_s27 = smov %s1061_s30  ;;  %19 = sbr.rel (!%p17_p9) target bundleno = 3 (0x3), region = 83 }
 0x247   :  { %718 = vsyncpa [#allocation3], 1 }
 0x248   :  { %720 = vsyncpa [#allocation3 + $0x1], 1 }

</bundles_post_ra>
